<compile_context>
chip_gen: v6e
topology: v6e:2x2x1
jax: 0.10.0
libtpu: 0.0.40
codegen_flags: <defaults>
</compile_context>

<pallas_src>
import functools

import jax
import jax.numpy as jnp
import numpy as np
from jax import lax
from jax.experimental import pallas as pl
from jax.experimental.pallas import tpu as pltpu

NUM_CHANNELS = 21          # forward indexes channels up to 20, so C must be 21
_LANES = 128
_DEFAULT_TILE_ROWS = 512   # good for v6e/v5e; sweep 1024 (f32) / 2048 (bf16) on v7x

_UNTRAV_CHANNELS = (2, 3, 4, 5, 6, 7, 8, 10, 11, 12, 13, 14, 15, 16, 17, 18)

# Partial-sum slots emitted per (image, pixel tile).
_Q_C0, _Q_C1, _Q_S0, _Q_S1, _Q_KL = range(5)
_NUM_Q = 5


def _fold_rows(q):
    """(tr, 128) f32 -> (8, 128) partial sums.

    tr % 8 == 0 (tiled path): layout-preserving reshape + vreg-wise VALU adds.
    Otherwise (tiny single-tile images): one cross-sublane reduce into row 0.
    """
    tr = q.shape[0]
    if tr % 8 == 0:
        return jnp.sum(q.reshape(tr // 8, 8, _LANES), axis=0)
    s = jnp.sum(q, axis=0, keepdims=True)                       # (1, 128)
    row0 = lax.broadcasted_iota(jnp.int32, (8, _LANES), 0) == 0
    return jnp.where(row0, jnp.broadcast_to(s, (8, _LANES)), 0.0)


def _neg_softplus(d):
    """-softplus(d): the log_softmax of the *first* logit of the pair (a, a+d).
    Stable, and only 2 transcendentals (exp, log)."""
    return -(jnp.maximum(d, 0.0) + jnp.log(1.0 + jnp.exp(-jnp.abs(d))))


def _loss_kernel(x_ref, t_ref, out_ref, *, n_pixels):
    # x_ref: (1, C, tr, 128) native dtype; t_ref: (1, tr, 128) int; out: (1,1,5,8,128) f32
    j = pl.program_id(1)
    tr = t_ref.shape[1]
    f32 = jnp.float32

    # ---- per-pixel validity mask ------------------------------------------
    # Handles (a) the ragged last pixel tile (Pallas fills out-of-bounds rows
    # of the block with garbage that may be inf/NaN) and (b) lane padding when
    # H*W % 128 != 0.  All masking uses select semantics, never multiply.
    limit = n_pixels - j * (tr * _LANES)
    row_i = lax.broadcasted_iota(jnp.int32, (tr, _LANES), 0)
    lane_i = lax.broadcasted_iota(jnp.int32, (tr, _LANES), 1)
    valid = (row_i * _LANES + lane_i) < limit

    # ---- class masks (ignore_index=255 / padding fall in neither) ----------
    t = t_ref[0].astype(jnp.int32)
    m0 = valid & (t == 0)
    m1 = valid & (t == 1)

    # ---- 2-class log_softmax over channels 19:21 via softplus of the logit
    #      difference (5 EUP transcendentals / pixel total) -------------------
    x19 = x_ref[0, 19].astype(f32)
    x20 = x_ref[0, 20].astype(f32)
    d = x20 - x19
    lp0 = _neg_softplus(d)          # log p(class 0)
    lp1 = lp0 + d                   # log p(class 1)

    # ---- traversable / untraversable channel aggregation (dense slab adds) --
    # TODO(synk): on v7x with bf16 inputs this 17-add / per-channel-cast chain
    # can move to the idle MXU as a constant (2,21) matmul once a bundle dump
    # shows VALU (not DMA) is the binding unit; at f32 it is hidden under DMA.
    trav = (x_ref[0, 0].astype(f32)
            + x_ref[0, 1].astype(f32)
            + x_ref[0, 9].astype(f32))
    untrav = x_ref[0, _UNTRAV_CHANNELS[0]].astype(f32)
    for c in _UNTRAV_CHANNELS[1:]:
        untrav = untrav + x_ref[0, c].astype(f32)
    e = trav - untrav
    lq0 = _neg_softplus(e)          # log q(class 0) of [untrav, trav]

    # ---- KLDivLoss(log_softmax([untrav,trav]), softmax(x[19:21])) per pixel:
    #      p0*(lp0-lq0) + p1*(lp1-lq1) == (lp0-lq0) + p1*(d-e)   (p0 + p1 == 1)
    p1 = jnp.exp(lp1)
    kl = (lp0 - lq0) + p1 * (d - e)

    # ---- per-tile partial sums, folded to one (8,128) vreg each -------------
    out_ref[0, 0, _Q_C0] = _fold_rows(m0.astype(f32))
    out_ref[0, 0, _Q_C1] = _fold_rows(m1.astype(f32))
    out_ref[0, 0, _Q_S0] = _fold_rows(jnp.where(m0, lp0, 0.0))
    out_ref[0, 0, _Q_S1] = _fold_rows(jnp.where(m1, lp1, 0.0))
    out_ref[0, 0, _Q_KL] = _fold_rows(jnp.where(valid, kl, 0.0))


def image_based_ce_loss_trav(inputs, targets, *, upper_bound=1.0,
                             tile_rows=_DEFAULT_TILE_ROWS):
    """inputs: (N, 21, H, W) float (f32 or bf16; bf16 recommended — HBM-bound);
    targets: (N, H, W) int in {0, 1, 255} (uint8/int8 recommended).
    Returns (loss, loss2). NaN for an image with zero non-255 pixels (as in PyTorch)."""
    N, C, H, W = inputs.shape
    assert C == NUM_CHANNELS
    P = H * W
    rows = -(-P // _LANES)
    p128 = rows * _LANES

    x = inputs.reshape(N, C, P)
    t = targets.reshape(N, P)
    if p128 != P:
        # TODO(synk): only remaining copy — triggers only when H*W is not a
        # multiple of the 128-lane width; padded pixels are masked in-kernel
        # so the pad values are irrelevant.
        x = jnp.pad(x, ((0, 0), (0, 0), (0, p128 - P)))
        t = jnp.pad(t, ((0, 0), (0, p128 - P)))
    x = x.reshape(N, C, rows, _LANES)       # free reshape: channel-major slabs
    t = t.reshape(N, rows, _LANES)

    # Pixel-row tiling.  Multi-tile => tr multiple of 32 (covers f32 (8,128),
    # bf16 (16,128) and int8/uint8 (32,128) layout constraints); a single tile
    # spanning the whole image may be any size (block == full array dims).
    tr_req = max(8, int(tile_rows))
    if rows <= tr_req:
        tr = rows
    else:
        tr = min(max(32, (tr_req // 32) * 32), rows)
    n_tiles = -(-rows // tr)

    x_bytes = C * tr * _LANES * x.dtype.itemsize
    t_bytes = tr * _LANES * t.dtype.itemsize
    o_bytes = _NUM_Q * 8 * _LANES * 4
    vmem_limit = int(min(48 * 2**20,
                         max(32 * 2**20, 4 * (x_bytes + t_bytes + o_bytes))))

    kernel = functools.partial(_loss_kernel, n_pixels=P)

    parts = pl.pallas_call(
        kernel,
        out_shape=jax.ShapeDtypeStruct((N, n_tiles, _NUM_Q, 8, _LANES),
                                       jnp.float32),
        grid=(N, n_tiles),
        in_specs=[
            pl.BlockSpec((1, C, tr, _LANES), lambda i, j: (i, 0, j, 0)),
            pl.BlockSpec((1, tr, _LANES), lambda i, j: (i, j, 0)),
        ],
        out_specs=pl.BlockSpec((1, 1, _NUM_Q, 8, _LANES),
                               lambda i, j: (i, j, 0, 0, 0)),
        compiler_params=pltpu.CompilerParams(
            dimension_semantics=("parallel", "parallel"),
            vmem_limit_bytes=vmem_limit),
    )(x, t)

    # ---- tiny per-image finalize (histogram weights folded algebraically) ---
    sums = jnp.sum(parts, axis=(1, 3, 4))                        # (N, 5)
    c0, c1 = sums[:, _Q_C0], sums[:, _Q_C1]
    s0, s1 = sums[:, _Q_S0], sums[:, _Q_S1]
    kl = sums[:, _Q_KL]
    total = c0 + c1
    h0, h1 = c0 / total, c1 / total
    w0 = jnp.where(h0 != 0.0, upper_bound * (1.0 - h0), 0.0) + 1.0
    w1 = jnp.where(h1 != 0.0, upper_bound * (1.0 - h1), 0.0) + 1.0
    nll = -(w0 * s0 + w1 * s1) / (w0 * c0 + w1 * c1)
    kld = kl / jnp.float32(2 * P)
    return jnp.sum(nll), jnp.sum(kld)


def _reference(inputs, targets, upper_bound=1.0):
    """Plain-JAX reference mirroring the PyTorch forward."""
    N = inputs.shape[0]
    loss = 0.0
    loss2 = 0.0
    for i in range(N):
        x = inputs[i].astype(jnp.float32)   # (21, H, W)
        t = targets[i]                      # (H, W)
        c0 = jnp.sum(t == 0).astype(jnp.float32)
        c1 = jnp.sum(t == 1).astype(jnp.float32)
        valid = c0 + c1
        h0, h1 = c0 / valid, c1 / valid
        w0 = jnp.where(h0 != 0, upper_bound * (1 - h0), 0.0) + 1.0
        w1 = jnp.where(h1 != 0, upper_bound * (1 - h1), 0.0) + 1.0
        lp = jax.nn.log_softmax(x[19:21], axis=0)
        m0, m1 = (t == 0), (t == 1)
        num = -(jnp.sum(jnp.where(m0, w0 * lp[0], 0.0))
                + jnp.sum(jnp.where(m1, w1 * lp[1], 0.0)))
        den = jnp.sum(jnp.where(m0, w0, 0.0)) + jnp.sum(jnp.where(m1, w1, 0.0))
        nll = num / den
        trav = x[0] + x[1] + x[9]
        untrav = jnp.sum(x[2:9], axis=0) + jnp.sum(x[10:19], axis=0)
        lq = jax.nn.log_softmax(jnp.stack([untrav, trav], axis=0), axis=0)
        p2 = jax.nn.softmax(x[19:21], axis=0)
        kld = jnp.sum(p2 * (jnp.log(p2) - lq)) / (2 * x.shape[1] * x.shape[2])
        loss = loss + nll
        loss2 = loss2 + kld
    return loss, loss2


def _run_case(key, N, H, W, *, in_dtype=jnp.float32, tgt_dtype=jnp.int32,
              tile_rows=_DEFAULT_TILE_ROWS):
    k1, k2, k3 = jax.random.split(key, 3)
    inputs = jax.random.normal(k1, (N, NUM_CHANNELS, H, W),
                               dtype=jnp.float32).astype(in_dtype)
    targets = jax.random.randint(k2, (N, H, W), 0, 2, dtype=jnp.int32)
    ignore = jax.random.uniform(k3, (N, H, W)) < 0.1       # a few ignore=255 px
    targets = jnp.where(ignore, jnp.int32(255), targets).astype(tgt_dtype)

    loss, loss2 = image_based_ce_loss_trav(inputs, targets, tile_rows=tile_rows)
    jax.block_until_ready((loss, loss2))

    ref_loss, ref_loss2 = _reference(inputs, targets)
    np.testing.assert_allclose(np.asarray(loss), np.asarray(ref_loss),
                               rtol=1e-3, atol=1e-4)
    np.testing.assert_allclose(np.asarray(loss2), np.asarray(ref_loss2),
                               rtol=1e-3, atol=1e-4)


if __name__ == "__main__":
    key = jax.random.PRNGKey(0)
    ka, kb, kc, kd = jax.random.split(key, 4)

    # Small aligned image, f32 inputs, int32 targets, single tile.
    _run_case(ka, N=2, H=16, W=16)
    # Non-128-multiple pixel count: minimal lane pad + in-kernel masking; uint8 targets.
    _run_case(kb, N=2, H=17, W=13, tgt_dtype=jnp.uint8)
    # Multi-tile grid with a ragged last tile (garbage rows masked), bf16 + uint8.
    _run_case(kc, N=1, H=96, W=96, in_dtype=jnp.bfloat16, tgt_dtype=jnp.uint8,
              tile_rows=32)
    # Single tile whose row count is not a multiple of 8 (fallback fold path).
    _run_case(kd, N=2, H=64, W=130)

    print("KERNEL_OK")
</pallas_src>

<mosaic_0001>
module attributes {stable_mosaic.version = 11 : i64} {
  func.func @_loss_kernel(%arg0: i32, %arg1: i32, %arg2: memref<1x21x2x128xf32, #tpu.memory_space<vmem>>, %arg3: memref<1x2x128xi32, #tpu.memory_space<vmem>>, %arg4: memref<1x1x5x8x128xf32, #tpu.memory_space<vmem>>) attributes {dimension_semantics = [#tpu.dimension_semantics<parallel>, #tpu.dimension_semantics<parallel>], iteration_bounds = array<i64: 2, 1>, scalar_prefetch = 0 : i64, scratch_operands = 0 : i64, tpu.core_type = #tpu.core_type<tc>, window_params = [{transform_indices = @transform_0, window_bounds = array<i64: 1, 21, 2, 128>}, {transform_indices = @transform_1, window_bounds = array<i64: 1, 2, 128>}, {transform_indices = @transform_2, window_bounds = array<i64: 1, 1, 5, 8, 128>}]} {
    %c256_i32 = arith.constant 256 : i32
    %0 = arith.muli %arg1, %c256_i32 : i32
    %c256_i32_0 = arith.constant 256 : i32
    %1 = arith.subi %c256_i32_0, %0 : i32
    %2 = tpu.iota {dimensions = array<i32: 0>} : vector<2x128xi32>
    %3 = tpu.iota {dimensions = array<i32: 1>} : vector<2x128xi32>
    %c128_i32 = arith.constant 128 : i32
    %4 = vector.broadcast %c128_i32 : i32 to vector<2x128xi32>
    %5 = arith.muli %2, %4 : vector<2x128xi32>
    %6 = arith.addi %5, %3 : vector<2x128xi32>
    %7 = vector.broadcast %1 : i32 to vector<2x128xi32>
    %8 = arith.cmpi slt, %6, %7 : vector<2x128xi32>
    %c0 = arith.constant 0 : index
    %c0_1 = arith.constant 0 : index
    %c0_2 = arith.constant 0 : index
    %9 = vector.load %arg3[%c0, %c0_1, %c0_2] : memref<1x2x128xi32, #tpu.memory_space<vmem>>, vector<1x2x128xi32>
    %10 = vector.shape_cast %9 : vector<1x2x128xi32> to vector<2x128xi32>
    %c0_i32 = arith.constant 0 : i32
    %11 = vector.broadcast %c0_i32 : i32 to vector<2x128xi32>
    %12 = arith.cmpi eq, %10, %11 : vector<2x128xi32>
    %13 = arith.andi %8, %12 : vector<2x128xi1>
    %c1_i32 = arith.constant 1 : i32
    %14 = vector.broadcast %c1_i32 : i32 to vector<2x128xi32>
    %15 = arith.cmpi eq, %10, %14 : vector<2x128xi32>
    %16 = arith.andi %8, %15 : vector<2x128xi1>
    %c0_3 = arith.constant 0 : index
    %c19 = arith.constant 19 : index
    %c0_4 = arith.constant 0 : index
    %c0_5 = arith.constant 0 : index
    %17 = vector.load %arg2[%c0_3, %c19, %c0_4, %c0_5] : memref<1x21x2x128xf32, #tpu.memory_space<vmem>>, vector<1x1x2x128xf32>
    %18 = vector.shape_cast %17 : vector<1x1x2x128xf32> to vector<2x128xf32>
    %c0_6 = arith.constant 0 : index
    %c20 = arith.constant 20 : index
    %c0_7 = arith.constant 0 : index
    %c0_8 = arith.constant 0 : index
    %19 = vector.load %arg2[%c0_6, %c20, %c0_7, %c0_8] : memref<1x21x2x128xf32, #tpu.memory_space<vmem>>, vector<1x1x2x128xf32>
    %20 = vector.shape_cast %19 : vector<1x1x2x128xf32> to vector<2x128xf32>
    %21 = arith.subf %20, %18 : vector<2x128xf32>
    %cst = arith.constant 0.000000e+00 : f32
    %22 = vector.broadcast %cst : f32 to vector<2x128xf32>
    %23 = arith.maximumf %21, %22 : vector<2x128xf32>
    %24 = math.absf %21 : vector<2x128xf32>
    %cst_9 = arith.constant 0.000000e+00 : f32
    %25 = vector.broadcast %cst_9 : f32 to vector<2x128xf32>
    %26 = arith.subf %25, %24 : vector<2x128xf32>
    %27 = math.exp %26 : vector<2x128xf32>
    %cst_10 = arith.constant 1.000000e+00 : f32
    %28 = vector.broadcast %cst_10 : f32 to vector<2x128xf32>
    %29 = arith.addf %28, %27 : vector<2x128xf32>
    %30 = math.log %29 : vector<2x128xf32>
    %31 = arith.addf %23, %30 : vector<2x128xf32>
    %cst_11 = arith.constant 0.000000e+00 : f32
    %32 = vector.broadcast %cst_11 : f32 to vector<2x128xf32>
    %33 = arith.subf %32, %31 : vector<2x128xf32>
    %34 = arith.addf %33, %21 : vector<2x128xf32>
    %c0_12 = arith.constant 0 : index
    %c0_13 = arith.constant 0 : index
    %c0_14 = arith.constant 0 : index
    %c0_15 = arith.constant 0 : index
    %35 = vector.load %arg2[%c0_12, %c0_13, %c0_14, %c0_15] : memref<1x21x2x128xf32, #tpu.memory_space<vmem>>, vector<1x1x2x128xf32>
    %36 = vector.shape_cast %35 : vector<1x1x2x128xf32> to vector<2x128xf32>
    %c0_16 = arith.constant 0 : index
    %c1 = arith.constant 1 : index
    %c0_17 = arith.constant 0 : index
    %c0_18 = arith.constant 0 : index
    %37 = vector.load %arg2[%c0_16, %c1, %c0_17, %c0_18] : memref<1x21x2x128xf32, #tpu.memory_space<vmem>>, vector<1x1x2x128xf32>
    %38 = vector.shape_cast %37 : vector<1x1x2x128xf32> to vector<2x128xf32>
    %39 = arith.addf %36, %38 : vector<2x128xf32>
    %c0_19 = arith.constant 0 : index
    %c9 = arith.constant 9 : index
    %c0_20 = arith.constant 0 : index
    %c0_21 = arith.constant 0 : index
    %40 = vector.load %arg2[%c0_19, %c9, %c0_20, %c0_21] : memref<1x21x2x128xf32, #tpu.memory_space<vmem>>, vector<1x1x2x128xf32>
    %41 = vector.shape_cast %40 : vector<1x1x2x128xf32> to vector<2x128xf32>
    %42 = arith.addf %39, %41 : vector<2x128xf32>
    %c0_22 = arith.constant 0 : index
    %c2 = arith.constant 2 : index
    %c0_23 = arith.constant 0 : index
    %c0_24 = arith.constant 0 : index
    %43 = vector.load %arg2[%c0_22, %c2, %c0_23, %c0_24] : memref<1x21x2x128xf32, #tpu.memory_space<vmem>>, vector<1x1x2x128xf32>
    %44 = vector.shape_cast %43 : vector<1x1x2x128xf32> to vector<2x128xf32>
    %c0_25 = arith.constant 0 : index
    %c3 = arith.constant 3 : index
    %c0_26 = arith.constant 0 : index
    %c0_27 = arith.constant 0 : index
    %45 = vector.load %arg2[%c0_25, %c3, %c0_26, %c0_27] : memref<1x21x2x128xf32, #tpu.memory_space<vmem>>, vector<1x1x2x128xf32>
    %46 = vector.shape_cast %45 : vector<1x1x2x128xf32> to vector<2x128xf32>
    %47 = arith.addf %44, %46 : vector<2x128xf32>
    %c0_28 = arith.constant 0 : index
    %c4 = arith.constant 4 : index
    %c0_29 = arith.constant 0 : index
    %c0_30 = arith.constant 0 : index
    %48 = vector.load %arg2[%c0_28, %c4, %c0_29, %c0_30] : memref<1x21x2x128xf32, #tpu.memory_space<vmem>>, vector<1x1x2x128xf32>
    %49 = vector.shape_cast %48 : vector<1x1x2x128xf32> to vector<2x128xf32>
    %50 = arith.addf %47, %49 : vector<2x128xf32>
    %c0_31 = arith.constant 0 : index
    %c5 = arith.constant 5 : index
    %c0_32 = arith.constant 0 : index
    %c0_33 = arith.constant 0 : index
    %51 = vector.load %arg2[%c0_31, %c5, %c0_32, %c0_33] : memref<1x21x2x128xf32, #tpu.memory_space<vmem>>, vector<1x1x2x128xf32>
    %52 = vector.shape_cast %51 : vector<1x1x2x128xf32> to vector<2x128xf32>
    %53 = arith.addf %50, %52 : vector<2x128xf32>
    %c0_34 = arith.constant 0 : index
    %c6 = arith.constant 6 : index
    %c0_35 = arith.constant 0 : index
    %c0_36 = arith.constant 0 : index
    %54 = vector.load %arg2[%c0_34, %c6, %c0_35, %c0_36] : memref<1x21x2x128xf32, #tpu.memory_space<vmem>>, vector<1x1x2x128xf32>
    %55 = vector.shape_cast %54 : vector<1x1x2x128xf32> to vector<2x128xf32>
    %56 = arith.addf %53, %55 : vector<2x128xf32>
    %c0_37 = arith.constant 0 : index
    %c7 = arith.constant 7 : index
    %c0_38 = arith.constant 0 : index
    %c0_39 = arith.constant 0 : index
    %57 = vector.load %arg2[%c0_37, %c7, %c0_38, %c0_39] : memref<1x21x2x128xf32, #tpu.memory_space<vmem>>, vector<1x1x2x128xf32>
    %58 = vector.shape_cast %57 : vector<1x1x2x128xf32> to vector<2x128xf32>
    %59 = arith.addf %56, %58 : vector<2x128xf32>
    %c0_40 = arith.constant 0 : index
    %c8 = arith.constant 8 : index
    %c0_41 = arith.constant 0 : index
    %c0_42 = arith.constant 0 : index
    %60 = vector.load %arg2[%c0_40, %c8, %c0_41, %c0_42] : memref<1x21x2x128xf32, #tpu.memory_space<vmem>>, vector<1x1x2x128xf32>
    %61 = vector.shape_cast %60 : vector<1x1x2x128xf32> to vector<2x128xf32>
    %62 = arith.addf %59, %61 : vector<2x128xf32>
    %c0_43 = arith.constant 0 : index
    %c10 = arith.constant 10 : index
    %c0_44 = arith.constant 0 : index
    %c0_45 = arith.constant 0 : index
    %63 = vector.load %arg2[%c0_43, %c10, %c0_44, %c0_45] : memref<1x21x2x128xf32, #tpu.memory_space<vmem>>, vector<1x1x2x128xf32>
    %64 = vector.shape_cast %63 : vector<1x1x2x128xf32> to vector<2x128xf32>
    %65 = arith.addf %62, %64 : vector<2x128xf32>
    %c0_46 = arith.constant 0 : index
    %c11 = arith.constant 11 : index
    %c0_47 = arith.constant 0 : index
    %c0_48 = arith.constant 0 : index
    %66 = vector.load %arg2[%c0_46, %c11, %c0_47, %c0_48] : memref<1x21x2x128xf32, #tpu.memory_space<vmem>>, vector<1x1x2x128xf32>
    %67 = vector.shape_cast %66 : vector<1x1x2x128xf32> to vector<2x128xf32>
    %68 = arith.addf %65, %67 : vector<2x128xf32>
    %c0_49 = arith.constant 0 : index
    %c12 = arith.constant 12 : index
    %c0_50 = arith.constant 0 : index
    %c0_51 = arith.constant 0 : index
    %69 = vector.load %arg2[%c0_49, %c12, %c0_50, %c0_51] : memref<1x21x2x128xf32, #tpu.memory_space<vmem>>, vector<1x1x2x128xf32>
    %70 = vector.shape_cast %69 : vector<1x1x2x128xf32> to vector<2x128xf32>
    %71 = arith.addf %68, %70 : vector<2x128xf32>
    %c0_52 = arith.constant 0 : index
    %c13 = arith.constant 13 : index
    %c0_53 = arith.constant 0 : index
    %c0_54 = arith.constant 0 : index
    %72 = vector.load %arg2[%c0_52, %c13, %c0_53, %c0_54] : memref<1x21x2x128xf32, #tpu.memory_space<vmem>>, vector<1x1x2x128xf32>
    %73 = vector.shape_cast %72 : vector<1x1x2x128xf32> to vector<2x128xf32>
    %74 = arith.addf %71, %73 : vector<2x128xf32>
    %c0_55 = arith.constant 0 : index
    %c14 = arith.constant 14 : index
    %c0_56 = arith.constant 0 : index
    %c0_57 = arith.constant 0 : index
    %75 = vector.load %arg2[%c0_55, %c14, %c0_56, %c0_57] : memref<1x21x2x128xf32, #tpu.memory_space<vmem>>, vector<1x1x2x128xf32>
    %76 = vector.shape_cast %75 : vector<1x1x2x128xf32> to vector<2x128xf32>
    %77 = arith.addf %74, %76 : vector<2x128xf32>
    %c0_58 = arith.constant 0 : index
    %c15 = arith.constant 15 : index
    %c0_59 = arith.constant 0 : index
    %c0_60 = arith.constant 0 : index
    %78 = vector.load %arg2[%c0_58, %c15, %c0_59, %c0_60] : memref<1x21x2x128xf32, #tpu.memory_space<vmem>>, vector<1x1x2x128xf32>
    %79 = vector.shape_cast %78 : vector<1x1x2x128xf32> to vector<2x128xf32>
    %80 = arith.addf %77, %79 : vector<2x128xf32>
    %c0_61 = arith.constant 0 : index
    %c16 = arith.constant 16 : index
    %c0_62 = arith.constant 0 : index
    %c0_63 = arith.constant 0 : index
    %81 = vector.load %arg2[%c0_61, %c16, %c0_62, %c0_63] : memref<1x21x2x128xf32, #tpu.memory_space<vmem>>, vector<1x1x2x128xf32>
    %82 = vector.shape_cast %81 : vector<1x1x2x128xf32> to vector<2x128xf32>
    %83 = arith.addf %80, %82 : vector<2x128xf32>
    %c0_64 = arith.constant 0 : index
    %c17 = arith.constant 17 : index
    %c0_65 = arith.constant 0 : index
    %c0_66 = arith.constant 0 : index
    %84 = vector.load %arg2[%c0_64, %c17, %c0_65, %c0_66] : memref<1x21x2x128xf32, #tpu.memory_space<vmem>>, vector<1x1x2x128xf32>
    %85 = vector.shape_cast %84 : vector<1x1x2x128xf32> to vector<2x128xf32>
    %86 = arith.addf %83, %85 : vector<2x128xf32>
    %c0_67 = arith.constant 0 : index
    %c18 = arith.constant 18 : index
    %c0_68 = arith.constant 0 : index
    %c0_69 = arith.constant 0 : index
    %87 = vector.load %arg2[%c0_67, %c18, %c0_68, %c0_69] : memref<1x21x2x128xf32, #tpu.memory_space<vmem>>, vector<1x1x2x128xf32>
    %88 = vector.shape_cast %87 : vector<1x1x2x128xf32> to vector<2x128xf32>
    %89 = arith.addf %86, %88 : vector<2x128xf32>
    %90 = arith.subf %42, %89 : vector<2x128xf32>
    %cst_70 = arith.constant 0.000000e+00 : f32
    %91 = vector.broadcast %cst_70 : f32 to vector<2x128xf32>
    %92 = arith.maximumf %90, %91 : vector<2x128xf32>
    %93 = math.absf %90 : vector<2x128xf32>
    %cst_71 = arith.constant 0.000000e+00 : f32
    %94 = vector.broadcast %cst_71 : f32 to vector<2x128xf32>
    %95 = arith.subf %94, %93 : vector<2x128xf32>
    %96 = math.exp %95 : vector<2x128xf32>
    %cst_72 = arith.constant 1.000000e+00 : f32
    %97 = vector.broadcast %cst_72 : f32 to vector<2x128xf32>
    %98 = arith.addf %97, %96 : vector<2x128xf32>
    %99 = math.log %98 : vector<2x128xf32>
    %100 = arith.addf %92, %99 : vector<2x128xf32>
    %cst_73 = arith.constant 0.000000e+00 : f32
    %101 = vector.broadcast %cst_73 : f32 to vector<2x128xf32>
    %102 = arith.subf %101, %100 : vector<2x128xf32>
    %103 = math.exp %34 : vector<2x128xf32>
    %104 = arith.subf %33, %102 : vector<2x128xf32>
    %105 = arith.subf %21, %90 : vector<2x128xf32>
    %106 = arith.mulf %103, %105 : vector<2x128xf32>
    %107 = arith.addf %104, %106 : vector<2x128xf32>
    %108 = arith.extui %13 : vector<2x128xi1> to vector<2x128xi32>
    %109 = arith.sitofp %108 : vector<2x128xi32> to vector<2x128xf32>
    %cst_74 = arith.constant dense<0.000000e+00> : vector<128xf32>
    %110 = vector.multi_reduction <add>, %109, %cst_74 [0] : vector<2x128xf32> to vector<128xf32>
    %111 = vector.shape_cast %110 : vector<128xf32> to vector<1x128xf32>
    %112 = tpu.iota {dimensions = array<i32: 0>} : vector<8x128xi32>
    %c0_i32_75 = arith.constant 0 : i32
    %113 = vector.broadcast %c0_i32_75 : i32 to vector<8x128xi32>
    %114 = arith.cmpi eq, %112, %113 : vector<8x128xi32>
    %115 = vector.shape_cast %111 : vector<1x128xf32> to vector<1x128xf32>
    %116 = vector.broadcast %115 : vector<1x128xf32> to vector<8x128xf32>
    %cst_76 = arith.constant 0.000000e+00 : f32
    %117 = vector.broadcast %cst_76 : f32 to vector<8x128xf32>
    %118 = arith.select %114, %116, %117 : vector<8x128xi1>, vector<8x128xf32>
    %c0_77 = arith.constant 0 : index
    %c0_78 = arith.constant 0 : index
    %c0_79 = arith.constant 0 : index
    %c0_80 = arith.constant 0 : index
    %c0_81 = arith.constant 0 : index
    %119 = vector.load %arg4[%c0_77, %c0_78, %c0_79, %c0_80, %c0_81] : memref<1x1x5x8x128xf32, #tpu.memory_space<vmem>>, vector<1x1x1x8x128xf32>
    %120 = vector.shape_cast %119 : vector<1x1x1x8x128xf32> to vector<8x128xf32>
    %121 = vector.shape_cast %118 : vector<8x128xf32> to vector<1x1x1x8x128xf32>
    tpu.vector_store %arg4[%c0_77, %c0_78, %c0_79, %c0_80, %c0_81], %121 {strides = array<i32>} : memref<1x1x5x8x128xf32, #tpu.memory_space<vmem>>, vector<1x1x1x8x128xf32>,
    %122 = arith.extui %16 : vector<2x128xi1> to vector<2x128xi32>
    %123 = arith.sitofp %122 : vector<2x128xi32> to vector<2x128xf32>
    %cst_82 = arith.constant dense<0.000000e+00> : vector<128xf32>
    %124 = vector.multi_reduction <add>, %123, %cst_82 [0] : vector<2x128xf32> to vector<128xf32>
    %125 = vector.shape_cast %124 : vector<128xf32> to vector<1x128xf32>
    %126 = tpu.iota {dimensions = array<i32: 0>} : vector<8x128xi32>
    %c0_i32_83 = arith.constant 0 : i32
    %127 = vector.broadcast %c0_i32_83 : i32 to vector<8x128xi32>
    %128 = arith.cmpi eq, %126, %127 : vector<8x128xi32>
    %129 = vector.shape_cast %125 : vector<1x128xf32> to vector<1x128xf32>
    %130 = vector.broadcast %129 : vector<1x128xf32> to vector<8x128xf32>
    %cst_84 = arith.constant 0.000000e+00 : f32
    %131 = vector.broadcast %cst_84 : f32 to vector<8x128xf32>
    %132 = arith.select %128, %130, %131 : vector<8x128xi1>, vector<8x128xf32>
    %c0_85 = arith.constant 0 : index
    %c0_86 = arith.constant 0 : index
    %c1_87 = arith.constant 1 : index
    %c0_88 = arith.constant 0 : index
    %c0_89 = arith.constant 0 : index
    %133 = vector.load %arg4[%c0_85, %c0_86, %c1_87, %c0_88, %c0_89] : memref<1x1x5x8x128xf32, #tpu.memory_space<vmem>>, vector<1x1x1x8x128xf32>
    %134 = vector.shape_cast %133 : vector<1x1x1x8x128xf32> to vector<8x128xf32>
    %135 = vector.shape_cast %132 : vector<8x128xf32> to vector<1x1x1x8x128xf32>
    tpu.vector_store %arg4[%c0_85, %c0_86, %c1_87, %c0_88, %c0_89], %135 {strides = array<i32>} : memref<1x1x5x8x128xf32, #tpu.memory_space<vmem>>, vector<1x1x1x8x128xf32>,
    %cst_90 = arith.constant 0.000000e+00 : f32
    %136 = vector.broadcast %cst_90 : f32 to vector<2x128xf32>
    %137 = arith.select %13, %33, %136 : vector<2x128xi1>, vector<2x128xf32>
    %cst_91 = arith.constant dense<0.000000e+00> : vector<128xf32>
    %138 = vector.multi_reduction <add>, %137, %cst_91 [0] : vector<2x128xf32> to vector<128xf32>
    %139 = vector.shape_cast %138 : vector<128xf32> to vector<1x128xf32>
    %140 = tpu.iota {dimensions = array<i32: 0>} : vector<8x128xi32>
    %c0_i32_92 = arith.constant 0 : i32
    %141 = vector.broadcast %c0_i32_92 : i32 to vector<8x128xi32>
    %142 = arith.cmpi eq, %140, %141 : vector<8x128xi32>
    %143 = vector.shape_cast %139 : vector<1x128xf32> to vector<1x128xf32>
    %144 = vector.broadcast %143 : vector<1x128xf32> to vector<8x128xf32>
    %cst_93 = arith.constant 0.000000e+00 : f32
    %145 = vector.broadcast %cst_93 : f32 to vector<8x128xf32>
    %146 = arith.select %142, %144, %145 : vector<8x128xi1>, vector<8x128xf32>
    %c0_94 = arith.constant 0 : index
    %c0_95 = arith.constant 0 : index
    %c2_96 = arith.constant 2 : index
    %c0_97 = arith.constant 0 : index
    %c0_98 = arith.constant 0 : index
    %147 = vector.load %arg4[%c0_94, %c0_95, %c2_96, %c0_97, %c0_98] : memref<1x1x5x8x128xf32, #tpu.memory_space<vmem>>, vector<1x1x1x8x128xf32>
    %148 = vector.shape_cast %147 : vector<1x1x1x8x128xf32> to vector<8x128xf32>
    %149 = vector.shape_cast %146 : vector<8x128xf32> to vector<1x1x1x8x128xf32>
    tpu.vector_store %arg4[%c0_94, %c0_95, %c2_96, %c0_97, %c0_98], %149 {strides = array<i32>} : memref<1x1x5x8x128xf32, #tpu.memory_space<vmem>>, vector<1x1x1x8x128xf32>,
    %cst_99 = arith.constant 0.000000e+00 : f32
    %150 = vector.broadcast %cst_99 : f32 to vector<2x128xf32>
    %151 = arith.select %16, %34, %150 : vector<2x128xi1>, vector<2x128xf32>
    %cst_100 = arith.constant dense<0.000000e+00> : vector<128xf32>
    %152 = vector.multi_reduction <add>, %151, %cst_100 [0] : vector<2x128xf32> to vector<128xf32>
    %153 = vector.shape_cast %152 : vector<128xf32> to vector<1x128xf32>
    %154 = tpu.iota {dimensions = array<i32: 0>} : vector<8x128xi32>
    %c0_i32_101 = arith.constant 0 : i32
    %155 = vector.broadcast %c0_i32_101 : i32 to vector<8x128xi32>
    %156 = arith.cmpi eq, %154, %155 : vector<8x128xi32>
    %157 = vector.shape_cast %153 : vector<1x128xf32> to vector<1x128xf32>
    %158 = vector.broadcast %157 : vector<1x128xf32> to vector<8x128xf32>
    %cst_102 = arith.constant 0.000000e+00 : f32
    %159 = vector.broadcast %cst_102 : f32 to vector<8x128xf32>
    %160 = arith.select %156, %158, %159 : vector<8x128xi1>, vector<8x128xf32>
    %c0_103 = arith.constant 0 : index
    %c0_104 = arith.constant 0 : index
    %c3_105 = arith.constant 3 : index
    %c0_106 = arith.constant 0 : index
    %c0_107 = arith.constant 0 : index
    %161 = vector.load %arg4[%c0_103, %c0_104, %c3_105, %c0_106, %c0_107] : memref<1x1x5x8x128xf32, #tpu.memory_space<vmem>>, vector<1x1x1x8x128xf32>
    %162 = vector.shape_cast %161 : vector<1x1x1x8x128xf32> to vector<8x128xf32>
    %163 = vector.shape_cast %160 : vector<8x128xf32> to vector<1x1x1x8x128xf32>
    tpu.vector_store %arg4[%c0_103, %c0_104, %c3_105, %c0_106, %c0_107], %163 {strides = array<i32>} : memref<1x1x5x8x128xf32, #tpu.memory_space<vmem>>, vector<1x1x1x8x128xf32>,
    %cst_108 = arith.constant 0.000000e+00 : f32
    %164 = vector.broadcast %cst_108 : f32 to vector<2x128xf32>
    %165 = arith.select %8, %107, %164 : vector<2x128xi1>, vector<2x128xf32>
    %cst_109 = arith.constant dense<0.000000e+00> : vector<128xf32>
    %166 = vector.multi_reduction <add>, %165, %cst_109 [0] : vector<2x128xf32> to vector<128xf32>
    %167 = vector.shape_cast %166 : vector<128xf32> to vector<1x128xf32>
    %168 = tpu.iota {dimensions = array<i32: 0>} : vector<8x128xi32>
    %c0_i32_110 = arith.constant 0 : i32
    %169 = vector.broadcast %c0_i32_110 : i32 to vector<8x128xi32>
    %170 = arith.cmpi eq, %168, %169 : vector<8x128xi32>
    %171 = vector.shape_cast %167 : vector<1x128xf32> to vector<1x128xf32>
    %172 = vector.broadcast %171 : vector<1x128xf32> to vector<8x128xf32>
    %cst_111 = arith.constant 0.000000e+00 : f32
    %173 = vector.broadcast %cst_111 : f32 to vector<8x128xf32>
    %174 = arith.select %170, %172, %173 : vector<8x128xi1>, vector<8x128xf32>
    %c0_112 = arith.constant 0 : index
    %c0_113 = arith.constant 0 : index
    %c4_114 = arith.constant 4 : index
    %c0_115 = arith.constant 0 : index
    %c0_116 = arith.constant 0 : index
    %175 = vector.load %arg4[%c0_112, %c0_113, %c4_114, %c0_115, %c0_116] : memref<1x1x5x8x128xf32, #tpu.memory_space<vmem>>, vector<1x1x1x8x128xf32>
    %176 = vector.shape_cast %175 : vector<1x1x1x8x128xf32> to vector<8x128xf32>
    %177 = vector.shape_cast %174 : vector<8x128xf32> to vector<1x1x1x8x128xf32>
    tpu.vector_store %arg4[%c0_112, %c0_113, %c4_114, %c0_115, %c0_116], %177 {strides = array<i32>} : memref<1x1x5x8x128xf32, #tpu.memory_space<vmem>>, vector<1x1x1x8x128xf32>,
    return
  }
  func.func @transform_0(%arg0: i32, %arg1: i32) -> (i32, i32, i32, i32) {
    %c0_i32 = arith.constant 0 : i32
    %c0_i32_0 = arith.constant 0 : i32
    %c0_i32_1 = arith.constant 0 : i32
    return %arg0, %c0_i32, %arg1, %c0_i32_0 : i32, i32, i32, i32
  }
  func.func @transform_1(%arg0: i32, %arg1: i32) -> (i32, i32, i32) {
    %c0_i32 = arith.constant 0 : i32
    %c0_i32_0 = arith.constant 0 : i32
    return %arg0, %arg1, %c0_i32 : i32, i32, i32
  }
  func.func @transform_2(%arg0: i32, %arg1: i32) -> (i32, i32, i32, i32, i32) {
    %c0_i32 = arith.constant 0 : i32
    %c0_i32_0 = arith.constant 0 : i32
    %c0_i32_1 = arith.constant 0 : i32
    %c0_i32_2 = arith.constant 0 : i32
    return %arg0, %arg1, %c0_i32, %c0_i32_0, %c0_i32_1 : i32, i32, i32, i32, i32
  }
}

</mosaic_0001>

<bundles_post_ra>
// kernel: tpu_custom_call.1
= control target key start
LH: loop header
LB: loop body
LE: loop exit
PB: predicated region body
PF: predicated region fallthrough
CT: control target
= control target key end

     0   :  { %7 = vsyncpa [#allocation3], 0  ;;  %s1053_s0 = inlined_call_operand.hbm [shape: f32[2,21,2,128], index: 0, kind: input, shape index: {}]   ;;  %s1054_s1 = inlined_call_operand.hbm [shape: s32[2,2,128], index: 1, kind: input, shape index: {}]   ;;  %s1055_s2 = inlined_call_operand.hbm [shape: f32[2,1,5,8,128], index: 2, kind: output, shape index: {}]  }
   0x1   :  { %9 = vsyncpa [#allocation3 + $0x1], 0 }
   0x2   :  { %10 = vsyncpa [#allocation6], 0 }
   0x3   :  { %12 = vsyncpa [#allocation6 + $0x1], 0 }
   0x4   :  { %13 = vsyncpa [#allocation4], 0 }
   0x5   :  { %15 = vsyncpa [#allocation4 + $0x1], 0  ;;  %s795_s9 = smov 0   ;;  %s797_s10 = smov 0  }
   0x6   :  { %s799_s11 = smov 0   ;;  %s801_s12 = smov 0  }
   0x7   :  { %s803_s13 = smov 0   ;;  %s805_s14 = smov 0  }
   0x8 LB: > { %s505_s15 = sadd.s32 4294967295, %s770_s14   ;;  %s506_s16 = sadd.s32 4294967294, %s770_s14   ;;  %s770_s14 = sphi %s805_s14, %s21_s14   ;;  %s766_s13 = sphi %s803_s13, %s1070_s13   ;;  %s762_s12 = sphi %s801_s12, %s1069_s12   ;;  %s758_s11 = sphi %s799_s11, %s1068_s11   ;;  %s754_s10 = sphi %s797_s10, %s1067_s10   ;;  %s750_s9 = sphi %s795_s9, %s1066_s9  }
   0x9   : > { %s33_s17 = sadd.s32 1, %s766_s13  ;;  %s42_s18 = sadd.s32 1, %s758_s11 }
   0xa   : > { %p35_p0 = scmp.ge.s32.totalorder %s33_s17, 2  ;;  %p49_p1 = scmp.ne.s32.totalorder %s758_s11, %s754_s10 }
   0xb   : > { %p50_p2 = scmp.eq.s32.totalorder %s770_s14, 0  ;;  %p55_p3 = scmp.ne.s32.totalorder %s754_s10, %s750_s9 }
   0xc   : > { %s1072_s17 = smov (%p35_p0, %s33_s17), 0  ;;  %p56_p5 = scmp.eq.s32.totalorder %s505_s15, 0 }
   0xd   : > { %p836_p4 = por %p50_p2, %p49_p1  ;;  %s37_s20 = ssub.s32 %s766_s13, %s1072_s17 }
   0xe   : > { %p109_p6 = scmp.eq.s32.totalorder %s505_s15, 1  ;;  %p40_p7 = scmp.eq.s32.totalorder %s37_s20, 0 }
   0xf   : > { %p842_p8 = por %p56_p5, %p55_p3  ;;  %p115_p10 = scmp.eq.s32.totalorder %s506_s16, 1 }
  0x10   : > { %p846_p9 = por %p109_p6, %p49_p1  ;;  %p508_p12 = scmp.ge.s32.totalorder %s770_s14, 2 }
  0x11   : > { %s851_s23 = scalar_select %p40_p7, %s758_s11, %s42_s18  }
  0x12   : > { %p853_p11 = por %p115_p10, %p55_p3  ;;  %p565_p13 = scmp.lt.s32.totalorder %s770_s14, 2 }
  0x13   : > { %s860_s25 = sand.u32 1, %s758_s11   ;;  %s544_s27 = smul.u32 672, %s766_s13 }
  0x14   : > { %s543_s26 = smul.u32 42, %s860_s25  ;;  %p866_p0 = pnand %p565_p13, %p836_p4 }
  0x15   : > { %s146_s3 = scalar_lea.hbm %s1053_s0, %s544_s27  ;;  %p512_p1 = scmp.ge.s32.totalorder %s770_s14, 1 }
  0x16   : > { %s139_s4 = scalar_lea.vmem [#allocation2], %s543_s26  ;;  %s136_s6 = scalar_lea.sflag [#allocation3], %s860_s25 }
  0x17   : > { %s147_s5 = sshll.u32 %s139_s4, 4  ;;  %p632_p2 = pneg %p866_p0  ;;  %s148_s5 = int_to_ptr.vmem [resolvable:$true] %s147_s5 }
  0x18   : > { %s643_s7 = scalar_lea.vmem %s148_s5, 672  ;;  %s772_s8 = smov [#allocation2]  }
  0x19   : > { %p644_p3 = scmp.ne.s32.totalorder %s148_s5, %s643_s7  ;;  %s648_s15 = sshll.u32 %s772_s8, 4  ;;  %s649_s15 = int_to_ptr.vmem [resolvable:$false] %s648_s15 }
  0x1a   : > { %s650_s16 = scalar_lea.vmem %s649_s15, 1344  ;;  %p651_p6 = scmp.lt.s32.totalorder %s148_s5, %s649_s15 }
  0x1b   : > { %p646_p4 = pnand %p644_p3, %p632_p2  ;;  %p652_p7 = scmp.lt.s32.totalorder %s650_s16, %s643_s7 }
  0x1d   : > { %p647_p5 = pneg %p646_p4  ;;  %p653_p10 = por %p652_p7, %p651_p6 }
  0x1f   : > { %p654_p13 = pnand %p653_p10, %p647_p5 }
  0x21   : > { %657 = shalt.err (!%p654_p13)
}
  0x22   : > { %s773_s18 = smov 32   ;;  %s774_s19 = smov 2  }
  0x23   : > { %557 = dma.hbm_to_vmem [thread:$0]  (!%p866_p0), %s146_s3, 672, %s148_s5, %s136_s6, %s773_s18, %s773_s18, %s774_s19  }
  0x24   : > { %p174_p3 = scmp.lt.s32.totalorder %s770_s14, 3  ;;  %s510_s20 = sshll.u32 %s860_s25, 1 }
  0x25   : > { %s511_s26 = sshll.u32 %s766_s13, 5  ;;  %s161_s7 = scalar_lea.vmem [#allocation5], %s510_s20 }
  0x26   : > { %p887_p4 = pnand %p512_p1, %p174_p3  ;;  %s167_s4 = scalar_lea.hbm %s1054_s1, %s511_s26 }
  0x27   : > { %s169_s8 = sshll.u32 %s161_s7, 4  ;;  %s158_s15 = scalar_lea.sflag [#allocation6], %s860_s25  ;;  %s170_s8 = int_to_ptr.vmem [resolvable:$true] %s169_s8 }
  0x28   : > { %s671_s16 = scalar_lea.vmem %s170_s8, 32  ;;  %s775_s3 = smov [#allocation5]  }
  0x29   : > { %p672_p5 = scmp.ne.s32.totalorder %s170_s8, %s671_s16  ;;  %s676_s5 = sshll.u32 %s775_s3, 4  ;;  %s677_s5 = int_to_ptr.vmem [resolvable:$false] %s676_s5 }
  0x2a   : > { %s678_s6 = scalar_lea.vmem %s677_s5, 64  ;;  %p679_p1 = scmp.lt.s32.totalorder %s170_s8, %s677_s5 }
  0x2b   : > { %p674_p6 = pnand %p672_p5, %p632_p2  ;;  %p680_p10 = scmp.lt.s32.totalorder %s678_s6, %s671_s16 }
  0x2d   : > { %p675_p7 = pneg %p674_p6  ;;  %p681_p13 = por %p680_p10, %p679_p1 }
  0x2f   : > { %p682_p3 = pnand %p681_p13, %p675_p7 }
  0x31   : > { %685 = shalt.err (!%p682_p3)
}
  0x32   : > { %560 = dma.hbm_to_vmem [thread:$0]  (!%p866_p0), %s167_s4, 32, %s170_s8, %s158_s15  }
  0x33   : > { %178 = sbr.rel (%p887_p4) target bundleno = 170 (0xaa), region = 28  ;;  %s903_s25 = sand.u32 (!%p887_p4), 1, %s754_s10  }
  0x34   : > { %s545_s18 = smul.u32 (!%p887_p4), 42, %s903_s25  ;;  %s181_s19 = scalar_lea.sflag (!%p887_p4), [#allocation3], %s903_s25 }
  0x36   : > { %s907_s20 = scalar_lea.vmem (!%p887_p4), [#allocation2], %s545_s18 }
  0x38   : > { %737 = dma.done.wait (%p842_p8), %s181_s19, 672  }
  0x39   : > { %739 = vsyncadd (%p842_p8), %s181_s19, 4294966624  ;;  %s513_s28 = sshll.u32 %s903_s25, 1  ;;  %s190_s26 = scalar_lea.sflag [#allocation6], %s903_s25 }
  0x3a   : > { %s193_s27 = scalar_lea.vmem [#allocation5], %s513_s28 }
  0x3b   : > { %741 = dma.done.wait (%p842_p8), %s190_s26, 32  }
  0x3c   : > { %743 = vsyncadd (%p842_p8), %s190_s26, 4294967264  ;;  %v221_v0 = vlaneseq  ;;  %vm323_vm0 = vcmask 1041408   ;;  %v229_v5 = vld [vmem:[%s193_s27] sm:$0x3]  ;;  %v514_v6 = vld [vmem:[%s907_s20 + $0x26] sm:$0x3] }
  0x3d   : > { %v515_v7 = vld [vmem:[%s907_s20 + $0x28] sm:$0x3]  ;;  %vm230_vm2 = vcmp.eq.s32.totalorder %v229_v5, 0  ;;  %vm232_vm3 = vcmp.eq.s32.totalorder %v229_v5, 1  ;;  %v776_v10 = vmov 0.0   ;;  %s546_s21 = smul.u32 40, %s903_s25 }
  0x3e   : > { %v919_v1 = vshrl.u32 %v221_v0, 7  ;;  %v224_v2 = vand.u32 127, %v221_v0  ;;  %v927_v8 = vsub.f32 %v515_v7, %v514_v6  ;;  %v518_v14 = vld [vmem:[%s907_s20 + $0x4] sm:$0x3]  ;;  %v519_v17 = vld [vmem:[%s907_s20 + $0x6] sm:$0x3] }
  0x3f   : > { %v520_v21 = vld [vmem:[%s907_s20 + $0x8] sm:$0x3]  ;;  %v261_v23 = vadd.f32 %v519_v17, %v518_v14  ;;  %v521_v26 = vld [vmem:[%s907_s20 + $0xa] sm:$0x3]  ;;  %v522_v30 = vld [vmem:[%s907_s20 + $0xc] sm:$0x3] }
  0x40   : > { %v225_v3 = vmul.u32 128, %v919_v1  ;;  %v240_v13 = vand.u32 2147483647, %v927_v8  ;;  %v523_v34 = vld [vmem:[%s907_s20 + $0xe] sm:$0x3]  ;;  %vm331_vm6 = vcmp.eq.s32.totalorder %v919_v1, 0 }
  0x41   : > { %v264_v28 = vadd.f32 %v520_v21, %v261_v23  ;;  %v524_v38 = vld [vmem:[%s907_s20 + $0x10] sm:$0x3]  ;;  %v525_v42 = vld [vmem:[%s907_s20 + $0x14] sm:$0x3]  ;;  %v526_v46 = vld [vmem:[%s907_s20 + $0x16] sm:$0x3] }
  0x42   : > { %v922_v4 = vadd.s32 %v225_v3, %v224_v2  ;;  %v241_v20 = vsub.f32 0.0, %v240_v13  ;;  %s961_s29 = scalar_lea.vmem [#allocation7], %s546_s21  ;;  %v527_v49 = vld [vmem:[%s907_s20 + $0x18] sm:$0x3]  ;;  %v528_v51 = vld [vmem:[%s907_s20 + $0x1a] sm:$0x3] }
  0x43   : > { %v267_v32 = vadd.f32 %v521_v26, %v264_v28  ;;  %v529_v55 = vld [vmem:[%s907_s20 + $0x1c] sm:$0x3]  ;;  %v250_v57 = vld [vmem:[%s907_s20] sm:$0x3]  ;;  %v516_v58 = vld [vmem:[%s907_s20 + $0x2] sm:$0x3] }
  0x44   : > { %vm228_vm1 = vcmp.lt.s32.totalorder %v922_v4, 256  ;;  %v242_v25 = vmul.f32 1.442695, %v241_v20  ;;  %v530_v59 = vld [vmem:[%s907_s20 + $0x1e] sm:$0x3]  ;;  %v253_v62 = vadd.f32 %v516_v58, %v250_v57  ;;  %v239_v13 = vmax.f32 %v927_v8, 0.0 }
  0x45   : > { %vm931_vm4 = vmand %vm228_vm1, %vm230_vm2  ;;  %v270_v36 = vadd.f32 %v522_v30, %v267_v32  ;;  %v531_v61 = vld [vmem:[%s907_s20 + $0x20] sm:$0x3]  ;;  %v517_v0 = vld [vmem:[%s907_s20 + $0x12] sm:$0x3]  ;;  %s547_s30 = smul.u32 640, %s762_s12  ;;  %s395_s4 = sshll.u32 %s961_s29, 4  ;;  %s997_s4 = int_to_ptr.vmem [resolvable:$true] %s395_s4 }
  0x46   : > { %v534_v11 = vsel %vm931_vm4, 1.0, %v776_v10  ;;  %vm939_vm5 = vmand %vm228_vm1, %vm232_vm3  ;;  %620 = vpow2.f32 %v242_v25  ;;  %v532_v2 = vld [vmem:[%s907_s20 + $0x22] sm:$0x3]  ;;  %v533_v5 = vld [vmem:[%s907_s20 + $0x24] sm:$0x3]  ;;  %v256_v6 = vadd.f32 %v517_v0, %v253_v62  ;;  %s380_s16 = scalar_lea.sflag [#allocation4], %s903_s25 }
  0x47   : > { %v324_v15 = vsel %vm323_vm0, %v534_v11, 0.0  ;;  %v535_v16 = vsel %vm939_vm5, 1.0, %v776_v10  ;;  %v273_v40 = vadd.f32 %v523_v34, %v270_v36  ;;  %s1002_s15 = scalar_lea.hbm %s1055_s2, %s547_s30  ;;  %s686_s3 = scalar_lea.vmem %s997_s4, 640 }
  0x48   : > { %v325_v18 = vrot.slane %v324_v15, 4  ;;  %v336_v19 = vsel %vm323_vm0, %v535_v16, 0.0  ;;  %p687_p8 = scmp.ne.s32.totalorder %s997_s4, %s686_s3  ;;  %s777_s12 = smov [#allocation7]  }
  0x49   : > { %v337_v22 = vrot.slane %v336_v19, 4  ;;  %v276_v44 = vadd.f32 %v524_v38, %v273_v40  ;;  %s690_s5 = sshll.u32 %s777_s12, 4  ;;  %s691_s5 = int_to_ptr.vmem [resolvable:$false] %s690_s5 }
  0x4a   : > { %v326_v24 = vadd.f32 %v325_v18, %v324_v15  ;;  %p688_p0 = pnand %p687_p8, %p846_p9  ;;  %s692_s6 = scalar_lea.vmem %s691_s5, 1280 }
  0x4b   : > { %v338_v27 = vadd.f32 %v337_v22, %v336_v19  ;;  %v279_v48 = vadd.f32 %v525_v42, %v276_v44  ;;  %p693_p4 = scmp.lt.s32.totalorder %s997_s4, %s691_s5  ;;  %p694_p5 = scmp.lt.s32.totalorder %s692_s6, %s686_s3 }
  0x4c   : > { %v327_v29 = vrot.slane %v326_v24, 2  ;;  %p689_p2 = pneg %p688_p0 }
  0x4d   : > { %v339_v31 = vrot.slane %v338_v27, 2  ;;  %v282_v50 = vadd.f32 %v526_v46, %v279_v48  ;;  %p695_p6 = por %p694_p5, %p693_p4 }
  0x4e   : > { %v328_v33 = vadd.f32 %v327_v29, %v326_v24 }
  0x4f   : > { %v340_v35 = vadd.f32 %v339_v31, %v338_v27  ;;  %v285_v53 = vadd.f32 %v527_v49, %v282_v50  ;;  %p696_p7 = pnand %p695_p6, %p689_p2 }
  0x50   : > { %v329_v37 = vrot.slane %v328_v33, 1 }
  0x51   : > { %v341_v39 = vrot.slane %v340_v35, 1  ;;  %v288_v56 = vadd.f32 %v528_v51, %v285_v53 }
  0x52   : > { %v330_v41 = vadd.f32 %v329_v37, %v328_v33 }
  0x53   : > { %v342_v43 = vadd.f32 %v341_v39, %v340_v35  ;;  %v621_v52 = vpop.eup %620  ;;  %v291_v60 = vadd.f32 %v529_v55, %v288_v56 }
  0x54   : > { %v332_v45 = vsel %vm331_vm6, %v330_v41, 0.0  ;;  %v244_v54 = vadd.f32 1.0, %v621_v52 }
  0x55   : > { %333 = vst [vmem:[%s961_s29] sm:$0xff] %v332_v45  ;;  %v343_v47 = vsel %vm331_vm6, %v342_v43, 0.0  ;;  %v294_v63 = vadd.f32 %v530_v59, %v291_v60 }
  0x56   : > { %536 = vst [vmem:[%s961_s29 + $0x8] sm:$0xff] %v343_v47  ;;  %622 = vlog2.f32 %v244_v54 }
  0x57   : > { %v297_v3 = vadd.f32 %v531_v61, %v294_v63 }
  0x59   : > { %v300_v7 = vadd.f32 %v532_v2, %v297_v3 }
  0x5b   : > { %v303_v10 = vadd.f32 %v533_v5, %v300_v7 }
  0x5d   : > { %v304_v11 = vsub.f32 %v256_v6, %v303_v10 }
  0x5f   : > { %v306_v15 = vand.u32 2147483647, %v304_v11  ;;  %v305_v41 = vmax.f32 %v304_v11, 0.0  ;;  %v318_v44 = vsub.f32 %v927_v8, %v304_v11 }
  0x61   : > { %v307_v17 = vsub.f32 0.0, %v306_v15 }
  0x63   : > { %v623_v14 = vpop.eup %622  ;;  %v308_v19 = vmul.f32 1.442695, %v307_v17 }
  0x64   : > { %v246_v16 = vmul.f32 0.6931472, %v623_v14 }
  0x65   : > { %624 = vpow2.f32 %v308_v19 }
  0x66   : > { %v247_v18 = vadd.f32 %v246_v16, %v239_v13 }
  0x68   : > { %v248_v20 = vsub.f32 0.0, %v247_v18 }
  0x6a   : > { %v346_v21 = vsel %vm931_vm4, %v248_v20, 0.0  ;;  %v249_v22 = vadd.f32 %v248_v20, %v927_v8 }
  0x6b   : > { %v347_v23 = vsel %vm323_vm0, %v346_v21, 0.0 }
  0x6c   : > { %v348_v24 = vrot.slane %v347_v23, 4  ;;  %v357_v25 = vsel %vm939_vm5, %v249_v22, 0.0  ;;  %v315_v37 = vmul.f32 1.442695, %v249_v22 }
  0x6d   : > { %v358_v26 = vsel %vm323_vm0, %v357_v25, 0.0 }
  0x6e   : > { %v349_v27 = vadd.f32 %v348_v24, %v347_v23  ;;  %v359_v28 = vrot.slane %v358_v26, 4 }
  0x70   : > { %v350_v29 = vrot.slane %v349_v27, 2  ;;  %v360_v30 = vadd.f32 %v359_v28, %v358_v26 }
  0x72   : > { %v351_v31 = vadd.f32 %v350_v29, %v349_v27  ;;  %v361_v32 = vrot.slane %v360_v30, 2  ;;  %v625_v34 = vpop.eup %624 }
  0x73   : > { %v310_v38 = vadd.f32 1.0, %v625_v34 }
  0x74   : > { %v352_v9 = vrot.slane %v351_v31, 1  ;;  %v362_v33 = vadd.f32 %v361_v32, %v360_v30 }
  0x75   : > { %626 = vlog2.f32 %v310_v38 }
  0x76   : > { %v353_v35 = vadd.f32 %v352_v9, %v351_v31  ;;  %v363_v36 = vrot.slane %v362_v33, 1  ;;  %628 = vpow2.f32 %v315_v37 }
  0x78   : > { %v354_v12 = vsel %vm331_vm6, %v353_v35, 0.0  ;;  %v364_v39 = vadd.f32 %v363_v36, %v362_v33 }
  0x79   : > { %537 = vst [vmem:[%s961_s29 + $0x10] sm:$0xff] %v354_v12 }
  0x7a   : > { %v365_v40 = vsel %vm331_vm6, %v364_v39, 0.0 }
  0x7b   : > { %538 = vst [vmem:[%s961_s29 + $0x18] sm:$0xff] %v365_v40 }
  0x82   : > { %v627_v42 = vpop.eup %626 }
  0x83   : > { %v312_v43 = vmul.f32 0.6931472, %v627_v42  ;;  %v629_v45 = vpop.eup %628 }
  0x84   : > { %v319_v48 = vmul.f32 %v629_v45, %v318_v44 }
  0x85   : > { %v313_v46 = vadd.f32 %v312_v43, %v305_v41 }
  0x87   : > { %v314_v47 = vsub.f32 0.0, %v313_v46 }
  0x89   : > { %v317_v49 = vsub.f32 %v248_v20, %v314_v47 }
  0x8b   : > { %v320_v50 = vadd.f32 %v319_v48, %v317_v49 }
  0x8d   : > { %v368_v51 = vsel %vm228_vm1, %v320_v50, 0.0 }
  0x8e   : > { %v369_v52 = vsel %vm323_vm0, %v368_v51, 0.0 }
  0x8f   : > { %v370_v53 = vrot.slane %v369_v52, 4 }
  0x91   : > { %v371_v54 = vadd.f32 %v370_v53, %v369_v52 }
  0x93   : > { %v372_v55 = vrot.slane %v371_v54, 2 }
  0x95   : > { %v373_v56 = vadd.f32 %v372_v55, %v371_v54 }
  0x97   : > { %v374_v8 = vrot.slane %v373_v56, 1 }
  0x99   : > { %v375_v57 = vadd.f32 %v374_v8, %v373_v56 }
  0x9b   : > { %v376_v4 = vsel %vm331_vm6, %v375_v57, 0.0 }
  0x9c   : > { %539 = vst [vmem:[%s961_s29 + $0x20] sm:$0xff] %v376_v4 }
  0x9d   : > { %699 = shalt.err (!%p696_p7)
}
  0x9e   : > { %s700_s18 = scalar_lea.hbm %s1002_s15, 640  ;;  %s704_s28 = scalar_lea.hbm %s1055_s2, 1280 }
  0x9f   : > { %p701_p1 = scmp.ne.s32.totalorder %s1002_s15, %s700_s18  ;;  %p705_p3 = scmp.lt.s32.totalorder %s1002_s15, %s1055_s2 }
  0xa0   : > { %p706_p8 = scmp.lt.s32.totalorder %s704_s28, %s700_s18 }
  0xa1   : > { %p702_p10 = pnand %p701_p1, %p846_p9 }
  0xa2   : > { %p707_p0 = por %p706_p8, %p705_p3 }
  0xa3   : > { %p703_p13 = pneg %p702_p10 }
  0xa5   : > { %p708_p2 = pnand %p707_p0, %p703_p13 }
  0xa7   : > { %711 = shalt.err (!%p708_p2)
}
  0xa8   : > { %s778_s21 = smov 128   ;;  %s779_s29 = smov 8  }
  0xa9   : > { %552 = dma.vmem_to_hbm [thread:$0]  (%p846_p9), %s997_s4, 640, %s1002_s15, %s380_s16, %s778_s21, %s778_s21, %s779_s29  }
  0xaa PF: > { %s410_s30 = sand.u32 1, %s750_s9   ;;  %p562_p4 = pnand %p508_p12, %p853_p11 }
  0xab   : > { %s411_s7 = scalar_lea.sflag [#allocation4], %s410_s30 }
  0xac   : > { %p563_p5 = pneg %p562_p4 }
  0xae   : > { %745 = dma.done.wait (%p563_p5), %s411_s7, 640  }
  0xaf   : > { %747 = vsyncadd (%p563_p5), %s411_s7, 4294966656  ;;  %s21_s14 = sadd.s32 1, %s770_s14   ;;  %s1066_s9 = smov %s754_s10 }
  0xb0   : > { %p18_p6 = scmp.ge.s32.totalorder %s21_s14, 4   ;;  %s1067_s10 = smov %s758_s11 }
  0xb1   : > { %s1068_s11 = smov %s851_s23  ;;  %s1069_s12 = smov %s766_s13 }
  0xb2   : > { %s1070_s13 = smov %s1072_s17  ;;  %20 = sbr.rel (!%p18_p6) target bundleno = 8 (0x8), region = 110 }
  0xb7   :  { %416 = vsyncpa [#allocation3], 1 }
  0xb8   :  { %418 = vsyncpa [#allocation3 + $0x1], 1 }
  0xb9   :  { %419 = vsyncpa [#allocation6], 1 }
  0xba   :  { %421 = vsyncpa [#allocation6 + $0x1], 1 }
  0xbb   :  { %422 = vsyncpa [#allocation4], 1 }
  0xbc   :  { %424 = vsyncpa [#allocation4 + $0x1], 1 }

</bundles_post_ra>
